<compile_context>
chip_gen: v7x
topology: tpu7x:2x2x1
jax: 0.10.0
libtpu: 0.0.40
codegen_flags: <defaults>
</compile_context>

<pallas_src>
import functools

import jax
import jax.numpy as jnp
from jax.experimental import pallas as pl
from jax.experimental.pallas import tpu as pltpu


# ----------------------------------------------------------------------------- kernels

def _fused_kernel(x_ref, w1_ref, w2_ref, o_ref, *, inv_hw):
    """Whole (C, HW) batch slice resident in VMEM: pool -> excite -> gate (1 read + 1 write).

    x_ref:  (1, C, HW)  native dtype     w1_ref: (mid, C) f32
    o_ref:  (1, C, HW)  native dtype     w2_ref: (C, mid) f32
    """
    x = x_ref[0]                                                                 # (C, HW)
    pooled = jnp.sum(x.astype(jnp.float32), axis=1, keepdims=True) * inv_hw      # (C, 1) f32
    h = jnp.dot(w1_ref[...], pooled, preferred_element_type=jnp.float32)         # (mid, 1)
    y = jnp.dot(w2_ref[...], h, preferred_element_type=jnp.float32)              # (C, 1)
    scale = (1.0 / (1.0 + jnp.exp(-y))).astype(x.dtype)                          # sigmoid
    o_ref[0] = x * scale                                                         # lane broadcast


def _pool_excite_kernel(x_ref, w1_ref, w2_ref, scale_ref, acc_ref, *, inv_hw):
    """Fallback phase 1: f32 pool over HW tiles; excitation folded into the last tile.

    x_ref:     (1, C, hw_tile)   current tile of x (channels on sublanes, HW on lanes)
    w1_ref:    (mid, C) f32      constant tiny block (stays resident across the grid)
    w2_ref:    (C, mid) f32
    scale_ref: (1, C, 1)         output gate, written on the last hw tile
    acc_ref:   (C, 1) f32        VMEM scratch accumulator (persists across the t axis)
    """
    t = pl.program_id(1)

    @pl.when(t == 0)
    def _():
        acc_ref[...] = jnp.zeros_like(acc_ref)

    acc_ref[...] += jnp.sum(x_ref[0].astype(jnp.float32), axis=1, keepdims=True)

    @pl.when(t == pl.num_programs(1) - 1)
    def _():
        pooled = acc_ref[...] * inv_hw                                           # (C, 1)
        h = jnp.dot(w1_ref[...], pooled, preferred_element_type=jnp.float32)     # (mid, 1)
        y = jnp.dot(w2_ref[...], h, preferred_element_type=jnp.float32)          # (C, 1)
        scale_ref[0] = (1.0 / (1.0 + jnp.exp(-y))).astype(scale_ref.dtype)


def _scale_mul_kernel(x_ref, s_ref, o_ref):
    """Fallback phase 2: lane-dense streaming broadcast multiply out = x * scale."""
    o_ref[0] = x_ref[0] * s_ref[0]                                 # (C, hw_tile) * (C, 1)


# ----------------------------------------------------------------------------- planning

def _vmem_plan():
    """(vmem_limit_bytes, hw_tile_budget_bytes) derived from the local chip's physical VMEM."""
    try:
        cap = int(pltpu.get_tpu_info().vmem_capacity_bytes)
    except Exception:                                # conservative default (v7x = 64 MiB)
        cap = 64 << 20
    limit = min(100 << 20, max(cap * 3 // 4, 12 << 20))   # ~96 MiB v5e/v6e, ~48 MiB v7x
    tile_budget = max(1 << 20, limit // 8)                # phase 2 needs ~4x tile, phase 1 ~3x
    return limit, tile_budget


def _pick_hw_tile(hw_padded, c, itemsize, budget_bytes):
    """Largest multiple-of-128 divisor of hw_padded with block bytes ~<= budget."""
    cap = max(128, (budget_bytes // max(1, c * itemsize)) // 128 * 128)
    t = min(hw_padded, cap)
    t -= t % 128
    t = max(t, 128)
    while hw_padded % t != 0:
        t -= 128
    return t


# ----------------------------------------------------------------------------- wrapper

@functools.partial(jax.jit, static_argnames=("force_two_phase",))
def global_context_attention(x_nchw, w1, w2, *, force_two_phase=False):
    """out = x * sigmoid(conv2(conv1(avgpool(x)))), operating directly on NCHW.

    x_nchw: (B, C, H, W)
    w1:     (mid, C)   squeezed 1x1-conv weight (C -> mid, no bias)
    w2:     (C, mid)   squeezed 1x1-conv weight (mid -> C, no bias)
    """
    B, C, H, W = x_nchw.shape
    HW = H * W
    x = x_nchw.reshape(B, C, HW)                    # free: contiguous NCHW reshape
    w1f = w1.astype(jnp.float32)
    w2f = w2.astype(jnp.float32)
    mid = w1f.shape[0]
    inv_hw = 1.0 / float(HW)
    itemsize = x.dtype.itemsize

    vmem_limit, tile_budget = _vmem_plan()
    slice_bytes = C * HW * itemsize
    wbytes = (w1f.size + w2f.size) * 4
    # double-buffered x in + out (4x slice) + f32 pool temp + weights + slack
    fused_need = 4 * slice_bytes + C * HW * 4 + 4 * wbytes + (2 << 20)

    if (not force_two_phase) and fused_need <= vmem_limit:
        # -------- fused single-pass kernel: 1 read + 1 write of x --------
        out = pl.pallas_call(
            functools.partial(_fused_kernel, inv_hw=inv_hw),
            out_shape=jax.ShapeDtypeStruct((B, C, HW), x.dtype),
            grid_spec=pltpu.PrefetchScalarGridSpec(
                num_scalar_prefetch=0,
                grid=(B,),
                in_specs=[
                    pl.BlockSpec((1, C, HW), lambda b: (b, 0, 0)),
                    pl.BlockSpec((mid, C), lambda b: (0, 0)),
                    pl.BlockSpec((C, mid), lambda b: (0, 0)),
                ],
                out_specs=pl.BlockSpec((1, C, HW), lambda b: (b, 0, 0)),
            ),
            compiler_params=pltpu.CompilerParams(
                dimension_semantics=("parallel",),
                vmem_limit_bytes=vmem_limit,
            ),
        )(x, w1f, w2f)
        return out.reshape(B, C, H, W)

    # -------- tiled two-phase fallback (very large C*HW slices) --------
    pad = (-HW) % 128
    HWp = HW + pad
    xp = jnp.pad(x, ((0, 0), (0, 0), (0, pad))) if pad else x   # zeros don't perturb the sum
    hw_tile = _pick_hw_tile(HWp, C, itemsize, tile_budget)
    n_t = HWp // hw_tile

    # Phase 1: pool over HW tiles; excitation folded into last tile -> (B, C, 1) gate.
    scale = pl.pallas_call(
        functools.partial(_pool_excite_kernel, inv_hw=inv_hw),
        out_shape=jax.ShapeDtypeStruct((B, C, 1), x.dtype),
        grid_spec=pltpu.PrefetchScalarGridSpec(
            num_scalar_prefetch=0,
            grid=(B, n_t),
            in_specs=[
                pl.BlockSpec((1, C, hw_tile), lambda b, t: (b, 0, t)),
                pl.BlockSpec((mid, C), lambda b, t: (0, 0)),
                pl.BlockSpec((C, mid), lambda b, t: (0, 0)),
            ],
            out_specs=pl.BlockSpec((1, C, 1), lambda b, t: (b, 0, 0)),
            scratch_shapes=[pltpu.VMEM((C, 1), jnp.float32)],
        ),
        compiler_params=pltpu.CompilerParams(
            dimension_semantics=("parallel", "arbitrary"),
            vmem_limit_bytes=vmem_limit,
        ),
    )(xp, w1f, w2f)

    # Phase 2: lane-dense streaming broadcast multiply.
    out = pl.pallas_call(
        _scale_mul_kernel,
        out_shape=jax.ShapeDtypeStruct((B, C, HWp), x.dtype),
        grid_spec=pltpu.PrefetchScalarGridSpec(
            num_scalar_prefetch=0,
            grid=(B, n_t),
            in_specs=[
                pl.BlockSpec((1, C, hw_tile), lambda b, t: (b, 0, t)),
                pl.BlockSpec((1, C, 1), lambda b, t: (b, 0, 0)),
            ],
            out_specs=pl.BlockSpec((1, C, hw_tile), lambda b, t: (b, 0, t)),
        ),
        compiler_params=pltpu.CompilerParams(
            dimension_semantics=("parallel", "parallel"),
            vmem_limit_bytes=vmem_limit,
        ),
    )(xp, scale)

    if pad:
        out = out[:, :, :HW]
    return out.reshape(B, C, H, W)


# ----------------------------------------------------------------------------- reference

def _reference(x_nchw, w1, w2):
    pooled = jnp.mean(x_nchw, axis=(2, 3))                 # (B, C)
    y = pooled @ w1.T                                      # (B, mid)
    y = y @ w2.T                                           # (B, C)
    y = jax.nn.sigmoid(y)[:, :, None, None]                # (B, C, 1, 1)
    return x_nchw * y


if __name__ == "__main__":
    B, C, H, W = 2, 64, 16, 16
    reduction = 16
    mid = C // reduction

    key = jax.random.PRNGKey(0)
    kx, k1, k2 = jax.random.split(key, 3)

    x = jax.random.normal(kx, (B, C, H, W), dtype=jnp.float32)
    # Deterministic synthetic 1x1-conv weights (conv weight shape (out, in, 1, 1) squeezed)
    w1 = jax.random.normal(k1, (mid, C), dtype=jnp.float32) * (1.0 / jnp.sqrt(C))
    w2 = jax.random.normal(k2, (C, mid), dtype=jnp.float32) * (1.0 / jnp.sqrt(mid))

    ref = _reference(x, w1, w2)

    # Default (fused single-kernel) path.
    out = jax.block_until_ready(global_context_attention(x, w1, w2))
    assert out.shape == (B, C, H, W)
    assert jnp.allclose(out, ref, atol=1e-5, rtol=1e-5)

    # Tiled two-phase fallback path (forced) on the same input.
    out2 = jax.block_until_ready(global_context_attention(x, w1, w2, force_two_phase=True))
    assert jnp.allclose(out2, ref, atol=1e-5, rtol=1e-5)

    # Non-128-multiple spatial size: fused path + padded two-phase fallback path.
    x_odd = jax.random.normal(kx, (B, C, 10, 10), dtype=jnp.float32)
    ref_odd = _reference(x_odd, w1, w2)
    out3 = jax.block_until_ready(global_context_attention(x_odd, w1, w2))
    assert jnp.allclose(out3, ref_odd, atol=1e-5, rtol=1e-5)
    out4 = jax.block_until_ready(global_context_attention(x_odd, w1, w2, force_two_phase=True))
    assert jnp.allclose(out4, ref_odd, atol=1e-5, rtol=1e-5)

    print("KERNEL_OK")
</pallas_src>

<mosaic_0001>
module attributes {stable_mosaic.version = 11 : i64} {
  func.func @_fused_kernel(%arg0: i32, %arg1: memref<1x64x256xf32, #tpu.memory_space<vmem>>, %arg2: memref<4x64xf32, #tpu.memory_space<vmem>>, %arg3: memref<64x4xf32, #tpu.memory_space<vmem>>, %arg4: memref<1x64x256xf32, #tpu.memory_space<vmem>>) attributes {dimension_semantics = [#tpu.dimension_semantics<parallel>], iteration_bounds = array<i64: 2>, scalar_prefetch = 0 : i64, scratch_operands = 0 : i64, tpu.core_type = #tpu.core_type<tc>, window_params = [{transform_indices = @transform_0, window_bounds = array<i64: 1, 64, 256>}, {pipeline_mode = #tpu.pipeline_mode<synchronous>, transform_indices = @transform_1, window_bounds = array<i64: 4, 64>}, {pipeline_mode = #tpu.pipeline_mode<synchronous>, transform_indices = @transform_2, window_bounds = array<i64: 64, 4>}, {transform_indices = @transform_3, window_bounds = array<i64: 1, 64, 256>}]} {
    %c0 = arith.constant 0 : index
    %c0_0 = arith.constant 0 : index
    %c0_1 = arith.constant 0 : index
    %0 = vector.load %arg1[%c0, %c0_0, %c0_1] : memref<1x64x256xf32, #tpu.memory_space<vmem>>, vector<1x64x256xf32>
    %1 = vector.shape_cast %0 : vector<1x64x256xf32> to vector<64x256xf32>
    %cst = arith.constant dense<0.000000e+00> : vector<64xf32>
    %2 = vector.multi_reduction <add>, %1, %cst [1] : vector<64x256xf32> to vector<64xf32>
    %3 = vector.shape_cast %2 : vector<64xf32> to vector<64x1xf32>
    %cst_2 = arith.constant 3.906250e-03 : f32
    %4 = vector.broadcast %cst_2 : f32 to vector<64x1xf32>
    %5 = arith.mulf %3, %4 : vector<64x1xf32>
    %c0_3 = arith.constant 0 : index
    %c0_4 = arith.constant 0 : index
    %6 = vector.load %arg2[%c0_3, %c0_4] : memref<4x64xf32, #tpu.memory_space<vmem>>, vector<4x64xf32>
    %cst_5 = arith.constant dense<0.000000e+00> : vector<4x1xf32>
    %7 = tpu.matmul %6, %5, %cst_5 {dimension_numbers = #tpu.dot_dimension_numbers<[1], [0], [0], [1], [0, 0, 1, 1], [], []>} : vector<4x64xf32>, vector<64x1xf32>, vector<4x1xf32> -> vector<4x1xf32>
    %c0_6 = arith.constant 0 : index
    %c0_7 = arith.constant 0 : index
    %8 = vector.load %arg3[%c0_6, %c0_7] : memref<64x4xf32, #tpu.memory_space<vmem>>, vector<64x4xf32>
    %cst_8 = arith.constant dense<0.000000e+00> : vector<64x1xf32>
    %9 = tpu.matmul %8, %7, %cst_8 {dimension_numbers = #tpu.dot_dimension_numbers<[1], [0], [0], [1], [0, 0, 1, 1], [], []>} : vector<64x4xf32>, vector<4x1xf32>, vector<64x1xf32> -> vector<64x1xf32>
    %cst_9 = arith.constant 0.000000e+00 : f32
    %10 = vector.broadcast %cst_9 : f32 to vector<64x1xf32>
    %11 = arith.subf %10, %9 : vector<64x1xf32>
    %12 = math.exp %11 : vector<64x1xf32>
    %cst_10 = arith.constant 1.000000e+00 : f32
    %13 = vector.broadcast %cst_10 : f32 to vector<64x1xf32>
    %14 = arith.addf %13, %12 : vector<64x1xf32>
    %cst_11 = arith.constant 1.000000e+00 : f32
    %15 = vector.broadcast %cst_11 : f32 to vector<64x1xf32>
    %16 = arith.divf %15, %14 : vector<64x1xf32>
    %17 = vector.broadcast %16 : vector<64x1xf32> to vector<64x256xf32>
    %18 = arith.mulf %1, %17 : vector<64x256xf32>
    %c0_12 = arith.constant 0 : index
    %c0_13 = arith.constant 0 : index
    %c0_14 = arith.constant 0 : index
    %19 = vector.load %arg4[%c0_12, %c0_13, %c0_14] : memref<1x64x256xf32, #tpu.memory_space<vmem>>, vector<1x64x256xf32>
    %20 = vector.shape_cast %19 : vector<1x64x256xf32> to vector<64x256xf32>
    %21 = vector.shape_cast %18 : vector<64x256xf32> to vector<1x64x256xf32>
    tpu.vector_store %arg4[%c0_12, %c0_13, %c0_14], %21 {strides = array<i32>} : memref<1x64x256xf32, #tpu.memory_space<vmem>>, vector<1x64x256xf32>,
    return
  }
  func.func @transform_0(%arg0: i32) -> (i32, i32, i32) {
    %c0_i32 = arith.constant 0 : i32
    %c0_i32_0 = arith.constant 0 : i32
    %c0_i32_1 = arith.constant 0 : i32
    return %arg0, %c0_i32, %c0_i32_0 : i32, i32, i32
  }
  func.func @transform_1(%arg0: i32) -> (i32, i32) {
    %c0_i32 = arith.constant 0 : i32
    %c0_i32_0 = arith.constant 0 : i32
    %c0_i32_1 = arith.constant 0 : i32
    return %c0_i32, %c0_i32_0 : i32, i32
  }
  func.func @transform_2(%arg0: i32) -> (i32, i32) {
    %c0_i32 = arith.constant 0 : i32
    %c0_i32_0 = arith.constant 0 : i32
    %c0_i32_1 = arith.constant 0 : i32
    return %c0_i32, %c0_i32_0 : i32, i32
  }
  func.func @transform_3(%arg0: i32) -> (i32, i32, i32) {
    %c0_i32 = arith.constant 0 : i32
    %c0_i32_0 = arith.constant 0 : i32
    %c0_i32_1 = arith.constant 0 : i32
    return %arg0, %c0_i32, %c0_i32_0 : i32, i32, i32
  }
}

</mosaic_0001>

<bundles_post_ra>
// kernel: global_context_attention.1
= control target key start
LH: loop header
LB: loop body
LE: loop exit
PB: predicated region body
PF: predicated region fallthrough
CT: control target
= control target key end

     0   :  { %s775_s12 = smov 0   ;;  %s916_s0 = inlined_call_operand.vmem [shape: f32[2,64,256], index: 0, kind: input, shape index: {}]   ;;  %s917_s1 = inlined_call_operand.vmem [shape: f32[4,64], index: 1, kind: input, shape index: {}]   ;;  %s918_s2 = inlined_call_operand.vmem [shape: f32[64,4], index: 2, kind: input, shape index: {}]   ;;  %s919_s3 = inlined_call_operand.vmem [shape: f32[2,64,256], index: 3, kind: output, shape index: {}]  }
   0x1 LB: > { %s611_s13 = sadd.s32 4294967295, %s749_s12   ;;  %p615_p0 = scmp.ge.s32.totalorder %s749_s12, 1  ;;  %s749_s12 = sphi %s775_s12, %s13_s12  }
   0x2   : > { %p137_p1 = scmp.lt.s32.totalorder %s749_s12, 3 }
   0x4   : > { %p138_p2 = pnand %p615_p0, %p137_p1 }
   0x5   : > { %p161_p3 = scmp.lt.s32.totalorder (!%p138_p2), %s611_s13, 1  ;;  %v751_v24 = vmov (!%p138_p2), 0.0|0.0   ;;  %vm752_vm0 = vmmov (!%p138_p2), 0   ;;  %v753_v25 = vmov (!%p138_p2), 0.0   ;;  %v219_v46 = vld [vmem:[%s917_s1] sm:$0xf] (!%p138_p2) }
   0x6   : > { %141 = sbr.rel (%p138_p2) target bundleno = 794 (0x31a), region = 32  ;;  %685 = vmatprep.subr.bf16.mxu0 (!%p138_p2), %v751_v24  ;;  %668 = vmatprep.mubr.msk.f32.mxu0 (!%p138_p2), %vm752_vm0, %v753_v25  ;;  %vm220_vm1 = vcmask (!%p138_p2), 523264   ;;  %v294_v47 = vld [vmem:[%s918_s2] sm:$0xff] (!%p138_p2)  ;;  %vm302_vm2 = vcmask (!%p138_p2), 31744   ;;  %vm327_vm3 = vcmask (!%p138_p2), 1043456   ;;  %v295_v49 = vld [vmem:[%s918_s2 + $0x8] sm:$0xff] (!%p138_p2) }
   0x7   : > { %673 = vmatprep.mubr.msk.f32.mxu1 (!%p138_p2), %vm302_vm2, %v294_v47  ;;  %v296_v51 = vld [vmem:[%s918_s2 + $0x10] sm:$0xff] (!%p138_p2)  ;;  %v297_v52 = vld [vmem:[%s918_s2 + $0x18] sm:$0xff] (!%p138_p2)  ;;  %v298_v53 = vld [vmem:[%s918_s2 + $0x20] sm:$0xff] (!%p138_p2)  ;;  %v754_v57 = vmov (!%p138_p2), 0  }
   0x8   : > { %v299_v54 = vld [vmem:[%s918_s2 + $0x28] sm:$0xff] (!%p138_p2)  ;;  %v300_v55 = vld [vmem:[%s918_s2 + $0x30] sm:$0xff] (!%p138_p2)  ;;  %v301_v56 = vld [vmem:[%s918_s2 + $0x38] sm:$0xff] (!%p138_p2)  ;;  %710 = vset.pattern.permute.xlu1 (!%p138_p2), %v754_v57  ;;  %709 = vset.pattern.permute.xlu0 (!%p138_p2), %v754_v57 }
   0xd   : > { %s921_s13 = smov (!%p161_p3, %s611_s13), 1 }
   0xe   : > { %s632_s14 = sshll.u32 %s921_s13, 7 }
   0xf   : > { %s165_s17 = scalar_lea.vmem %s916_s0, %s632_s14  ;;  %s879_s11 = scalar_lea.vmem %s919_s3, %s632_s14 }
  0x10   : > { %v791_v0 = vld [vmem:[%s165_s17 + $0x20] sm:$0xff]  ;;  %v793_v1 = vld [vmem:[%s165_s17 + $0x28] sm:$0xff]  ;;  %v801_v5 = vld [vmem:[%s165_s17 + $0x30] sm:$0xff] }
  0x11   : > { %v795_v2 = vld [vmem:[%s165_s17] sm:$0xff]  ;;  %v193_v3 = vadd.f32 %v793_v1, %v791_v0  ;;  %v799_v4 = vld [vmem:[%s165_s17 + $0x8] sm:$0xff]  ;;  %v803_v6 = vld [vmem:[%s165_s17 + $0x38] sm:$0xff] }
  0x12   : > { %v187_v7 = vadd.f32 %v799_v4, %v795_v2  ;;  %v807_v8 = vld [vmem:[%s165_s17 + $0x10] sm:$0xff]  ;;  %v809_v9 = vld [vmem:[%s165_s17 + $0x18] sm:$0xff]  ;;  %v196_v10 = vadd.f32 %v803_v6, %v801_v5  ;;  %v819_v14 = vld [vmem:[%s165_s17 + $0x40] sm:$0xff] }
  0x13   : > { %194 = vadd.xlane.f32.xlu1 %v193_v3  ;;  %v190_v11 = vadd.f32 %v809_v9, %v807_v8  ;;  %v815_v12 = vld [vmem:[%s165_s17 + $0x50] sm:$0xff]  ;;  %v817_v13 = vld [vmem:[%s165_s17 + $0x58] sm:$0xff]  ;;  %v821_v15 = vld [vmem:[%s165_s17 + $0x48] sm:$0xff] }
  0x14   : > { %188 = vadd.xlane.f32.xlu0 %v187_v7  ;;  %v202_v16 = vadd.f32 %v817_v13, %v815_v12  ;;  %v199_v17 = vadd.f32 %v821_v15, %v819_v14  ;;  %v827_v18 = vld [vmem:[%s165_s17 + $0x70] sm:$0xff]  ;;  %v829_v19 = vld [vmem:[%s165_s17 + $0x78] sm:$0xff]  ;;  %v831_v20 = vld [vmem:[%s165_s17 + $0x60] sm:$0xff] }
  0x15   : > { %v833_v21 = vld [vmem:[%s165_s17 + $0x68] sm:$0xff]  ;;  %v208_v22 = vadd.f32 %v829_v19, %v827_v18 }
  0x16   : > { %v205_v23 = vadd.f32 %v833_v21, %v831_v20 }
  0x17   : > { %197 = vadd.xlane.f32.xlu1 %v196_v10 }
  0x18   : > { %191 = vadd.xlane.f32.xlu0 %v190_v11 }
  0x1b   : > { %203 = vadd.xlane.f32.xlu1 %v202_v16 }
  0x1c   : > { %200 = vadd.xlane.f32.xlu0 %v199_v17 }
  0x1f   : > { %209 = vadd.xlane.f32.xlu1 %v208_v22 }
  0x20   : > { %206 = vadd.xlane.f32.xlu0 %v205_v23 }
  0xa0   : > { %v195_v26 = vpop.xlane.xlu1 %194 }
  0xa1   : > { %v189_v27 = vpop.xlane.xlu0 %188  ;;  %v213_v32 = vmul.f32 0.00390625, %v195_v26 }
  0xa2   : > { %v211_v30 = vmul.f32 0.00390625, %v189_v27 }
  0xa4   : > { %v198_v28 = vpop.xlane.xlu1 %197 }
  0xa5   : > { %v192_v29 = vpop.xlane.xlu0 %191  ;;  %v214_v33 = vmul.f32 0.00390625, %v198_v28 }
  0xa6   : > { %v212_v31 = vmul.f32 0.00390625, %v192_v29 }
  0xa7   : > { %v689_v39 = vpack.c.bf16 %v214_v33, %v213_v32 }
  0xa8   : > { %v686_v34 = vpack.c.bf16 %v212_v31, %v211_v30  ;;  %v204_v35 = vpop.xlane.xlu1 %203 }
  0xa9   : > { %v201_v36 = vpop.xlane.xlu0 %200  ;;  %v216_v37 = vmul.f32 0.00390625, %v204_v35 }
  0xaa   : > { %687 = vmatpush3.bf16.msra.mxu0 %v686_v34  ;;  %v215_v38 = vmul.f32 0.00390625, %v201_v36 }
  0xab   : > { %688 = vmatprep.subr.bf16.mxu0 %v751_v24 }
  0xac   : > { %v210_v40 = vpop.xlane.xlu1 %209  ;;  %v692_v42 = vpack.c.bf16 %v216_v37, %v215_v38 }
  0xad   : > { %v207_v41 = vpop.xlane.xlu0 %206  ;;  %v218_v43 = vmul.f32 0.00390625, %v210_v40 }
  0xae   : > { %690 = vmatpush3.bf16.msra.mxu0 %v689_v39  ;;  %v217_v44 = vmul.f32 0.00390625, %v207_v41 }
  0xaf   : > { %691 = vmatprep.subr.bf16.mxu0 %v751_v24 }
  0xb0   : > { %v695_v45 = vpack.c.bf16 %v218_v43, %v217_v44 }
  0xb2   : > { %693 = vmatpush3.bf16.msra.mxu0 %v692_v42 }
  0xb3   : > { %694 = vmatprep.subr.bf16.mxu0 %v751_v24 }
  0xb6   : > { %696 = vmatpush3.bf16.msra.mxu0 %v695_v45 }
  0xb9   : > { %669 = vmatmul.mubr.msk.f32.vlgmr.msra.gmra.mrb[0].mxu0 %vm220_vm1, %v219_v46 }
 0x18c   : > { %v290_v48 = vpop.f32.mrb[0].mxu0 }
 0x18d   : > { %v670_v50 = vpop.f32.mrb[1].mxu0  ;;  %671 = vmatprep.subr.msk.mxu1 %vm327_vm3, %v290_v48 }
 0x18e   : > { %672 = vmatpush3.msk.msra.mxu1 %vm327_vm3, %v290_v48 }
 0x18f   : > { %674 = vmatmul.mubr.msk.f32.vlgmr.msra.gmra.mrb[0].mxu1 %vm302_vm2, %v295_v49 }
 0x190   : > { %676 = vmatprep.mubr.msk.f32.mxu1 %vm302_vm2, %v296_v51 }
 0x193   : > { %677 = vmatmul.mubr.msk.f32.gmra.mrb[2].mxu1 %vm302_vm2, %v297_v52 }
 0x194   : > { %679 = vmatprep.mubr.msk.f32.mxu1 %vm302_vm2, %v298_v53 }
 0x197   : > { %680 = vmatmul.mubr.msk.f32.gmra.mrb[4].mxu1 %vm302_vm2, %v299_v54 }
 0x198   : > { %682 = vmatprep.mubr.msk.f32.mxu1 %vm302_vm2, %v300_v55 }
 0x19b   : > { %683 = vmatmul.mubr.msk.f32.gmra.mrb[6].mxu1 %vm302_vm2, %v301_v56 }
 0x262   : > { %v675_v58 = vpop.f32.mrb[0].mxu1 }
 0x263   : > { %v437_v59 = vsub.f32 0.0, %v675_v58  ;;  %v397_v60 = vpop.f32.mrb[1].mxu1 }
 0x264   : > { %v436_v61 = vsub.f32 0.0, %v397_v60 }
 0x265   : > { %v446_v62 = vmul.f32 1.442695, %v437_v59 }
 0x266   : > { %v444_v63 = vmul.f32 1.442695, %v436_v61  ;;  %v678_v3 = vpop.f32.mrb[2].mxu1 }
 0x267   : > { %711 = vpow2.f32 %v446_v62  ;;  %v439_v7 = vsub.f32 0.0, %v678_v3  ;;  %v407_v10 = vpop.f32.mrb[3].mxu1 }
 0x268   : > { %713 = vpow2.f32 %v444_v63  ;;  %v438_v11 = vsub.f32 0.0, %v407_v10 }
 0x269   : > { %v450_v16 = vmul.f32 1.442695, %v439_v7 }
 0x26a   : > { %v448_v17 = vmul.f32 1.442695, %v438_v11  ;;  %v681_v22 = vpop.f32.mrb[4].mxu1 }
 0x26b   : > { %715 = vpow2.f32 %v450_v16  ;;  %v441_v23 = vsub.f32 0.0, %v681_v22  ;;  %v417_v24 = vpop.f32.mrb[5].mxu1 }
 0x26c   : > { %717 = vpow2.f32 %v448_v17  ;;  %v440_v25 = vsub.f32 0.0, %v417_v24 }
 0x26d   : > { %v454_v26 = vmul.f32 1.442695, %v441_v23 }
 0x26e   : > { %v684_v27 = vpop.f32.mrb[6].mxu1  ;;  %v452_v28 = vmul.f32 1.442695, %v440_v25 }
 0x26f   : > { %719 = vpow2.f32 %v454_v26  ;;  %v427_v29 = vpop.f32.mrb[7].mxu1  ;;  %v443_v36 = vsub.f32 0.0, %v684_v27 }
 0x270   : > { %v442_v30 = vsub.f32 0.0, %v427_v29  ;;  %721 = vpow2.f32 %v452_v28 }
 0x271   : > { %v712_v31 = vpop.eup %711  ;;  %v458_v40 = vmul.f32 1.442695, %v443_v36 }
 0x272   : > { %v714_v32 = vpop.eup %713  ;;  %v461_v33 = vadd.f32 1.0, %v712_v31  ;;  %v456_v34 = vmul.f32 1.442695, %v442_v30 }
 0x273   : > { %v460_v35 = vadd.f32 1.0, %v714_v32 }
 0x274   : > { %723 = vrcp.f32 %v461_v33 }
 0x275   : > { %v716_v37 = vpop.eup %715  ;;  %725 = vrcp.f32 %v460_v35 }
 0x276   : > { %v718_v38 = vpop.eup %717  ;;  %v463_v39 = vadd.f32 1.0, %v716_v37  ;;  %727 = vpow2.f32 %v456_v34 }
 0x277   : > { %v462_v41 = vadd.f32 1.0, %v718_v38 }
 0x278   : > { %729 = vrcp.f32 %v463_v39 }
 0x279   : > { %v720_v42 = vpop.eup %719  ;;  %731 = vpow2.f32 %v458_v40 }
 0x27a   : > { %v465_v43 = vadd.f32 1.0, %v720_v42  ;;  %733 = vrcp.f32 %v462_v41  ;;  %v722_v44 = vpop.eup %721 }
 0x27b   : > { %v464_v48 = vadd.f32 1.0, %v722_v44 }
 0x27c   : > { %735 = vrcp.f32 %v465_v43 }
 0x27d   : > { %737 = vrcp.f32 %v464_v48 }
 0x27e   : > { %v724_v45 = vpop.eup %723 }
 0x27f   : > { %v726_v46 = vpop.eup %725  ;;  %491 = vperm.xlu1 %710, %v724_v45  }
 0x280   : > { %v728_v47 = vpop.eup %727  ;;  %486 = vperm.xlu0 %709, %v726_v46  }
 0x281   : > { %v466_v50 = vadd.f32 1.0, %v728_v47 }
 0x282   : > { %v730_v49 = vpop.eup %729 }
 0x283   : > { %501 = vperm.xlu1 %710, %v730_v49   ;;  %v732_v51 = vpop.eup %731  ;;  %739 = vrcp.f32 %v466_v50 }
 0x284   : > { %v734_v52 = vpop.eup %733  ;;  %v467_v54 = vadd.f32 1.0, %v732_v51 }
 0x286   : > { %v736_v53 = vpop.eup %735  ;;  %741 = vrcp.f32 %v467_v54 }
 0x287   : > { %496 = vperm.xlu1 %710, %v734_v52   ;;  %v738_v55 = vpop.eup %737 }
 0x28b   : > { %511 = vperm.xlu1 %710, %v736_v53  }
 0x28d   : > { %v740_v56 = vpop.eup %739 }
 0x28f   : > { %506 = vperm.xlu1 %710, %v738_v55  }
 0x290   : > { %v742_v57 = vpop.eup %741 }
 0x293   : > { %516 = vperm.xlu1 %710, %v740_v56  }
 0x297   : > { %521 = vperm.xlu1 %710, %v742_v57  }
 0x2fe   : > { %v492_v58 = vpop.permute.xlu1 %491 }
 0x2ff   : > { %v526_v59 = vmul.f32 %v492_v58, %v807_v8  ;;  %v527_v60 = vmul.f32 %v492_v58, %v809_v9  ;;  %v487_v61 = vpop.permute.xlu0 %486 }
 0x300   : > { %v524_v62 = vmul.f32 %v487_v61, %v795_v2  ;;  %v525_v63 = vmul.f32 %v487_v61, %v799_v4 }
 0x301   : > { %542 = vst [vmem:[%s879_s11 + $0x10] sm:$0xff] %v526_v59  ;;  %543 = vst [vmem:[%s879_s11 + $0x18] sm:$0xff] %v527_v60 }
 0x302   : > { %540 = vst [vmem:[%s879_s11] sm:$0xff] %v524_v62  ;;  %541 = vst [vmem:[%s879_s11 + $0x8] sm:$0xff] %v525_v63  ;;  %v502_v3 = vpop.permute.xlu1 %501 }
 0x303   : > { %v530_v7 = vmul.f32 %v502_v3, %v801_v5  ;;  %v531_v8 = vmul.f32 %v502_v3, %v803_v6 }
 0x305   : > { %546 = vst [vmem:[%s879_s11 + $0x30] sm:$0xff] %v530_v7  ;;  %547 = vst [vmem:[%s879_s11 + $0x38] sm:$0xff] %v531_v8 }
 0x306   : > { %v497_v9 = vpop.permute.xlu1 %496 }
 0x307   : > { %v528_v2 = vmul.f32 %v497_v9, %v791_v0  ;;  %v529_v4 = vmul.f32 %v497_v9, %v793_v1 }
 0x309   : > { %544 = vst [vmem:[%s879_s11 + $0x20] sm:$0xff] %v528_v2  ;;  %545 = vst [vmem:[%s879_s11 + $0x28] sm:$0xff] %v529_v4 }
 0x30a   : > { %v512_v10 = vpop.permute.xlu1 %511 }
 0x30b   : > { %v534_v11 = vmul.f32 %v512_v10, %v815_v12  ;;  %v535_v5 = vmul.f32 %v512_v10, %v817_v13 }
 0x30d   : > { %550 = vst [vmem:[%s879_s11 + $0x50] sm:$0xff] %v534_v11  ;;  %551 = vst [vmem:[%s879_s11 + $0x58] sm:$0xff] %v535_v5 }
 0x30e   : > { %v507_v6 = vpop.permute.xlu1 %506 }
 0x30f   : > { %v532_v16 = vmul.f32 %v507_v6, %v819_v14  ;;  %v533_v0 = vmul.f32 %v507_v6, %v821_v15 }
 0x311   : > { %548 = vst [vmem:[%s879_s11 + $0x40] sm:$0xff] %v532_v16  ;;  %549 = vst [vmem:[%s879_s11 + $0x48] sm:$0xff] %v533_v0 }
 0x312   : > { %v517_v1 = vpop.permute.xlu1 %516 }
 0x313   : > { %v536_v17 = vmul.f32 %v517_v1, %v831_v20  ;;  %v537_v22 = vmul.f32 %v517_v1, %v833_v21 }
 0x315   : > { %552 = vst [vmem:[%s879_s11 + $0x60] sm:$0xff] %v536_v17  ;;  %553 = vst [vmem:[%s879_s11 + $0x68] sm:$0xff] %v537_v22 }
 0x316   : > { %v522_v12 = vpop.permute.xlu1 %521 }
 0x317   : > { %v538_v13 = vmul.f32 %v522_v12, %v827_v18  ;;  %v539_v23 = vmul.f32 %v522_v12, %v829_v19 }
 0x319   : > { %554 = vst [vmem:[%s879_s11 + $0x70] sm:$0xff] %v538_v13  ;;  %555 = vst [vmem:[%s879_s11 + $0x78] sm:$0xff] %v539_v23 }
 0x31a PF: > { %s13_s12 = sadd.s32 1, %s749_s12  }
 0x31b   : > { %p10_p4 = scmp.ge.s32.totalorder %s13_s12, 4  }
 0x31d   :  { %12 = sbr.rel (!%p10_p4) target bundleno = 1 (0x1), region = 62 }

</bundles_post_ra>
